<compile_context>
chip_gen: v6e
topology: v6e:2x2x1
jax: 0.10.0
libtpu: 0.0.40
codegen_flags: <defaults>
</compile_context>

<pallas_src>
import jax
import jax.numpy as jnp
from jax.experimental import pallas as pl
from jax.experimental.pallas import tpu as pltpu


# --------------------------------------------------------------------------
# Kernels
# --------------------------------------------------------------------------
def _dcn_kernel_bd(x0_ref, w_ref, b_ref, o_ref):
    """Row layout: x0_ref (TB, D) with D on lanes (use when D % 128 == 0)."""
    x0 = x0_ref[...].astype(jnp.float32)          # (TB, D)
    w = w_ref[...].astype(jnp.float32)            # (L, D)  hoisted load/cast
    b = b_ref[...].astype(jnp.float32)            # (L, D)
    x = x0
    for i in range(w_ref.shape[0]):               # small static L -> unrolled
        # xw = x @ w_i^T -> (TB, 1); 1-wide output, keep it off the MXU.
        xw = jnp.sum(x * w[i][None, :], axis=-1, keepdims=True)
        x = x0 * xw + b[i][None, :] + x
    o_ref[...] = x.astype(o_ref.dtype)


def _dcn_kernel_db(x0_ref, w_ref, b_ref, o_ref):
    """Transposed layout: x0_ref (D, TB) with batch on lanes (use when D < 128
    or not lane-aligned). The dot is a sublane reduce, xw a sublane broadcast."""
    x0 = x0_ref[...].astype(jnp.float32)          # (D, TB)
    w = w_ref[...].astype(jnp.float32)            # (L, D)
    b = b_ref[...].astype(jnp.float32)            # (L, D)
    x = x0
    for i in range(w_ref.shape[0]):
        w_col = w[i][:, None]                     # (D, 1)
        b_col = b[i][:, None]                     # (D, 1)
        xw = jnp.sum(x * w_col, axis=0, keepdims=True)   # (1, TB)
        x = x0 * xw + b_col + x
    o_ref[...] = x.astype(o_ref.dtype)


# --------------------------------------------------------------------------
# Wrapper
# --------------------------------------------------------------------------
def _round_up(x, m):
    return ((x + m - 1) // m) * m


def _round_down(x, m):
    return (x // m) * m


# Streaming-tile VMEM budget (f32 in + out, each double-buffered). Kept well
# under the smallest default scoped limit (16 MiB on v5e) and far under v7x's
# 64 MiB physical VMEM.
_TILE_BUDGET_BYTES = 8 * 1024 * 1024
_VMEM_LIMIT_BYTES = 32 * 1024 * 1024


def _pick_batch_tile(B, D, multiple, cap):
    per_batch_row = D * 4 * 2 * 2              # f32 * (in + out) * 2 buffers
    tb = _round_down(max(multiple, _TILE_BUDGET_BYTES // per_batch_row), multiple)
    tb = max(multiple, min(cap, tb))
    if B > multiple:
        # Keep at least 2 grid steps so v7x's two TensorCores both get work.
        tb = min(tb, _round_up(pl.cdiv(B, 2), multiple))
    return tb


def dcn_layer(x, w, b, *, tb=None):
    """x: (B, D); w: (L, D) stacked Linear(D,1) weights; b: (L, D) biases."""
    B, D = x.shape
    L = w.shape[0]
    assert b.shape == (L, D)

    lane_dense = (D % 128 == 0)

    flops = 5 * L * B * D                        # dot + FMA chain per layer
    bytes_accessed = 2 * B * D * x.dtype.itemsize + 2 * L * D * 4
    cost = pl.CostEstimate(flops=flops, transcendentals=0,
                           bytes_accessed=bytes_accessed)
    cparams = pltpu.CompilerParams(
        dimension_semantics=("parallel",),
        vmem_limit_bytes=_VMEM_LIMIT_BYTES,
    )

    if lane_dense:
        # ---- (B, D) layout: D already a multiple of 128 -> unmasked stores.
        if tb is None:
            tb = _pick_batch_tile(B, D, multiple=8, cap=1024)
        Bp = _round_up(B, tb)
        xi = jnp.pad(x, ((0, Bp - B), (0, 0))) if Bp != B else x
        grid = (Bp // tb,)
        out = pl.pallas_call(
            _dcn_kernel_bd,
            out_shape=jax.ShapeDtypeStruct((Bp, D), x.dtype),
            grid_spec=pltpu.PrefetchScalarGridSpec(
                num_scalar_prefetch=0,
                grid=grid,
                in_specs=[
                    pl.BlockSpec((tb, D), lambda i: (i, 0)),   # streaming x0
                    pl.BlockSpec((L, D), lambda i: (0, 0)),    # resident w
                    pl.BlockSpec((L, D), lambda i: (0, 0)),    # resident b
                ],
                out_specs=pl.BlockSpec((tb, D), lambda i: (i, 0)),
            ),
            compiler_params=cparams,
            cost_estimate=cost,
        )(xi, w, b)
        return out[:B] if Bp != B else out

    # ---- Transposed (D, B) layout: batch on the 128-lane axis (lane-dense
    # stores even for small D such as 32).
    if tb is None:
        tb = _pick_batch_tile(B, D, multiple=128, cap=2048)
    tb = _round_up(tb, 128)
    Bp = _round_up(B, tb)
    xt = x.T                                     # (D, B) layout plumbing
    if Bp != B:
        xt = jnp.pad(xt, ((0, 0), (0, Bp - B)))
    grid = (Bp // tb,)
    out_t = pl.pallas_call(
        _dcn_kernel_db,
        out_shape=jax.ShapeDtypeStruct((D, Bp), x.dtype),
        grid_spec=pltpu.PrefetchScalarGridSpec(
            num_scalar_prefetch=0,
            grid=grid,
            in_specs=[
                pl.BlockSpec((D, tb), lambda i: (0, i)),       # streaming x0^T
                pl.BlockSpec((L, D), lambda i: (0, 0)),        # resident w
                pl.BlockSpec((L, D), lambda i: (0, 0)),        # resident b
            ],
            out_specs=pl.BlockSpec((D, tb), lambda i: (0, i)),
        ),
        compiler_params=cparams,
        cost_estimate=cost,
    )(xt, w, b)
    out_t = out_t[:, :B] if Bp != B else out_t
    return out_t.T


# --------------------------------------------------------------------------
# Pure-JAX reference (matches the PyTorch forward)
# --------------------------------------------------------------------------
def dcn_reference(x, w, b):
    x0 = x
    out = x
    for i in range(w.shape[0]):
        xw = out @ w[i][:, None]          # (B, 1)
        out = x0 * xw + b[i][None, :] + out
    return out


if __name__ == "__main__":
    key = jax.random.PRNGKey(0)

    # Case 1: small feature dim (D=32) -> lane-dense transposed path.
    B1, D1, L1 = 256, 32, 3
    k1, k2, k3, key = jax.random.split(key, 4)
    x1 = jax.random.normal(k1, (B1, D1), dtype=jnp.float32)
    w1 = jax.random.uniform(k2, (L1, D1), dtype=jnp.float32,
                            minval=-1.0, maxval=1.0) / jnp.sqrt(D1)
    b1 = 0.01 * jax.random.normal(k3, (L1, D1), dtype=jnp.float32)

    out1 = jax.block_until_ready(dcn_layer(x1, w1, b1))
    ref1 = dcn_reference(x1, w1, b1)
    assert out1.shape == (B1, D1)
    assert jnp.allclose(out1, ref1, atol=1e-5, rtol=1e-5), (
        f"case1 max abs err {jnp.max(jnp.abs(out1 - ref1))}")

    # Case 2: lane-aligned feature dim (D=128) -> natural (B, D) path.
    B2, D2, L2 = 64, 128, 2
    k4, k5, k6, key = jax.random.split(key, 4)
    x2 = jax.random.normal(k4, (B2, D2), dtype=jnp.float32)
    w2 = jax.random.uniform(k5, (L2, D2), dtype=jnp.float32,
                            minval=-1.0, maxval=1.0) / jnp.sqrt(D2)
    b2 = 0.01 * jax.random.normal(k6, (L2, D2), dtype=jnp.float32)

    out2 = jax.block_until_ready(dcn_layer(x2, w2, b2))
    ref2 = dcn_reference(x2, w2, b2)
    assert out2.shape == (B2, D2)
    assert jnp.allclose(out2, ref2, atol=1e-5, rtol=1e-5), (
        f"case2 max abs err {jnp.max(jnp.abs(out2 - ref2))}")

    print("KERNEL_OK")
</pallas_src>

<mosaic_0001>
module attributes {stable_mosaic.version = 11 : i64} {
  func.func @_dcn_kernel_db(%arg0: i32, %arg1: memref<32x128xf32, #tpu.memory_space<vmem>>, %arg2: memref<3x32xf32, #tpu.memory_space<vmem>>, %arg3: memref<3x32xf32, #tpu.memory_space<vmem>>, %arg4: memref<32x128xf32, #tpu.memory_space<vmem>>) attributes {dimension_semantics = [#tpu.dimension_semantics<parallel>], iteration_bounds = array<i64: 2>, scalar_prefetch = 0 : i64, scratch_operands = 0 : i64, tpu.core_type = #tpu.core_type<tc>, window_params = [{transform_indices = @transform_0, window_bounds = array<i64: 32, 128>}, {pipeline_mode = #tpu.pipeline_mode<synchronous>, transform_indices = @transform_1, window_bounds = array<i64: 3, 32>}, {pipeline_mode = #tpu.pipeline_mode<synchronous>, transform_indices = @transform_2, window_bounds = array<i64: 3, 32>}, {transform_indices = @transform_3, window_bounds = array<i64: 32, 128>}]} {
    %c0 = arith.constant 0 : index
    %c0_0 = arith.constant 0 : index
    %0 = vector.load %arg1[%c0, %c0_0] : memref<32x128xf32, #tpu.memory_space<vmem>>, vector<32x128xf32>
    %c0_1 = arith.constant 0 : index
    %c0_2 = arith.constant 0 : index
    %1 = vector.load %arg2[%c0_1, %c0_2] : memref<3x32xf32, #tpu.memory_space<vmem>>, vector<3x32xf32>
    %c0_3 = arith.constant 0 : index
    %c0_4 = arith.constant 0 : index
    %2 = vector.load %arg3[%c0_3, %c0_4] : memref<3x32xf32, #tpu.memory_space<vmem>>, vector<3x32xf32>
    %3 = vector.extract_strided_slice %1 {offsets = [0, 0], sizes = [1, 32], strides = [1, 1]} : vector<3x32xf32> to vector<1x32xf32>
    %4 = vector.shape_cast %3 : vector<1x32xf32> to vector<32xf32>
    %5 = vector.shape_cast %4 : vector<32xf32> to vector<32x1xf32>
    %6 = vector.extract_strided_slice %2 {offsets = [0, 0], sizes = [1, 32], strides = [1, 1]} : vector<3x32xf32> to vector<1x32xf32>
    %7 = vector.shape_cast %6 : vector<1x32xf32> to vector<32xf32>
    %8 = vector.shape_cast %7 : vector<32xf32> to vector<32x1xf32>
    %9 = vector.broadcast %5 : vector<32x1xf32> to vector<32x128xf32>
    %10 = arith.mulf %0, %9 : vector<32x128xf32>
    %cst = arith.constant dense<0.000000e+00> : vector<128xf32>
    %11 = vector.multi_reduction <add>, %10, %cst [0] : vector<32x128xf32> to vector<128xf32>
    %12 = vector.shape_cast %11 : vector<128xf32> to vector<1x128xf32>
    %13 = vector.broadcast %12 : vector<1x128xf32> to vector<32x128xf32>
    %14 = arith.mulf %0, %13 : vector<32x128xf32>
    %15 = vector.broadcast %8 : vector<32x1xf32> to vector<32x128xf32>
    %16 = arith.addf %14, %15 : vector<32x128xf32>
    %17 = arith.addf %16, %0 : vector<32x128xf32>
    %18 = vector.extract_strided_slice %1 {offsets = [1, 0], sizes = [1, 32], strides = [1, 1]} : vector<3x32xf32> to vector<1x32xf32>
    %19 = vector.shape_cast %18 : vector<1x32xf32> to vector<32xf32>
    %20 = vector.shape_cast %19 : vector<32xf32> to vector<32x1xf32>
    %21 = vector.extract_strided_slice %2 {offsets = [1, 0], sizes = [1, 32], strides = [1, 1]} : vector<3x32xf32> to vector<1x32xf32>
    %22 = vector.shape_cast %21 : vector<1x32xf32> to vector<32xf32>
    %23 = vector.shape_cast %22 : vector<32xf32> to vector<32x1xf32>
    %24 = vector.broadcast %20 : vector<32x1xf32> to vector<32x128xf32>
    %25 = arith.mulf %17, %24 : vector<32x128xf32>
    %cst_5 = arith.constant dense<0.000000e+00> : vector<128xf32>
    %26 = vector.multi_reduction <add>, %25, %cst_5 [0] : vector<32x128xf32> to vector<128xf32>
    %27 = vector.shape_cast %26 : vector<128xf32> to vector<1x128xf32>
    %28 = vector.broadcast %27 : vector<1x128xf32> to vector<32x128xf32>
    %29 = arith.mulf %0, %28 : vector<32x128xf32>
    %30 = vector.broadcast %23 : vector<32x1xf32> to vector<32x128xf32>
    %31 = arith.addf %29, %30 : vector<32x128xf32>
    %32 = arith.addf %31, %17 : vector<32x128xf32>
    %33 = vector.extract_strided_slice %1 {offsets = [2, 0], sizes = [1, 32], strides = [1, 1]} : vector<3x32xf32> to vector<1x32xf32>
    %34 = vector.shape_cast %33 : vector<1x32xf32> to vector<32xf32>
    %35 = vector.shape_cast %34 : vector<32xf32> to vector<32x1xf32>
    %36 = vector.extract_strided_slice %2 {offsets = [2, 0], sizes = [1, 32], strides = [1, 1]} : vector<3x32xf32> to vector<1x32xf32>
    %37 = vector.shape_cast %36 : vector<1x32xf32> to vector<32xf32>
    %38 = vector.shape_cast %37 : vector<32xf32> to vector<32x1xf32>
    %39 = vector.broadcast %35 : vector<32x1xf32> to vector<32x128xf32>
    %40 = arith.mulf %32, %39 : vector<32x128xf32>
    %cst_6 = arith.constant dense<0.000000e+00> : vector<128xf32>
    %41 = vector.multi_reduction <add>, %40, %cst_6 [0] : vector<32x128xf32> to vector<128xf32>
    %42 = vector.shape_cast %41 : vector<128xf32> to vector<1x128xf32>
    %43 = vector.broadcast %42 : vector<1x128xf32> to vector<32x128xf32>
    %44 = arith.mulf %0, %43 : vector<32x128xf32>
    %45 = vector.broadcast %38 : vector<32x1xf32> to vector<32x128xf32>
    %46 = arith.addf %44, %45 : vector<32x128xf32>
    %47 = arith.addf %46, %32 : vector<32x128xf32>
    %c0_7 = arith.constant 0 : index
    %c0_8 = arith.constant 0 : index
    %48 = vector.load %arg4[%c0_7, %c0_8] : memref<32x128xf32, #tpu.memory_space<vmem>>, vector<32x128xf32>
    tpu.vector_store %arg4[%c0_7, %c0_8], %47 {strides = array<i32>} : memref<32x128xf32, #tpu.memory_space<vmem>>, vector<32x128xf32>,
    return
  }
  func.func @transform_0(%arg0: i32) -> (i32, i32) {
    %c0_i32 = arith.constant 0 : i32
    %c0_i32_0 = arith.constant 0 : i32
    return %c0_i32, %arg0 : i32, i32
  }
  func.func @transform_1(%arg0: i32) -> (i32, i32) {
    %c0_i32 = arith.constant 0 : i32
    %c0_i32_0 = arith.constant 0 : i32
    %c0_i32_1 = arith.constant 0 : i32
    return %c0_i32, %c0_i32_0 : i32, i32
  }
  func.func @transform_2(%arg0: i32) -> (i32, i32) {
    %c0_i32 = arith.constant 0 : i32
    %c0_i32_0 = arith.constant 0 : i32
    %c0_i32_1 = arith.constant 0 : i32
    return %c0_i32, %c0_i32_0 : i32, i32
  }
  func.func @transform_3(%arg0: i32) -> (i32, i32) {
    %c0_i32 = arith.constant 0 : i32
    %c0_i32_0 = arith.constant 0 : i32
    return %c0_i32, %arg0 : i32, i32
  }
}

</mosaic_0001>

<bundles_post_ra>
// kernel: tpu_custom_call.1
= control target key start
LH: loop header
LB: loop body
LE: loop exit
PB: predicated region body
PF: predicated region fallthrough
CT: control target
= control target key end

     0   :  { %8 = vsyncpa [#allocation3], 0  ;;  %s1016_s0 = inlined_call_operand.hbm [shape: f32[32,256], index: 0, kind: input, shape index: {}]   ;;  %s1017_s1 = inlined_call_operand.hbm [shape: f32[3,32], index: 1, kind: input, shape index: {}]   ;;  %s1018_s2 = inlined_call_operand.hbm [shape: f32[3,32], index: 2, kind: input, shape index: {}]   ;;  %s1019_s3 = inlined_call_operand.hbm [shape: f32[32,256], index: 3, kind: output, shape index: {}]  }
   0x1   :  { %10 = vsyncpa [#allocation3 + $0x1], 0 }
   0x2   :  { %11 = vsyncpa [#allocation6], 0 }
   0x3   :  { %12 = vsyncpa [#allocation4], 0 }
   0x4   :  { %14 = vsyncpa [#allocation4 + $0x1], 0  ;;  %s786_s12 = smov 0   ;;  %s788_s13 = smov 0  }
   0x5   :  { %s790_s14 = smov 0   ;;  %s792_s15 = smov 0  }
   0x6 LB: > { %s807_s16 = sadd.s32 4294967295, %s754_s15   ;;  %s517_s17 = sadd.s32 4294967294, %s754_s15   ;;  %s754_s15 = sphi %s792_s15, %s1042_s15   ;;  %s750_s14 = sphi %s790_s14, %s1041_s14   ;;  %s746_s13 = sphi %s788_s13, %s1040_s13   ;;  %s742_s12 = sphi %s786_s12, %s1039_s12  }
   0x7   : > { %s811_s18 = sadd.s32 1, %s754_s15   ;;  %s27_s19 = sadd.s32 1, %s750_s14 }
   0x8   : > { %s24_s20 = ssub.s32 %s754_s15, %s811_s18  ;;  %p34_p0 = scmp.ne.s32.totalorder %s750_s14, %s746_s13 }
   0x9   : > { %p25_p1 = scmp.eq.s32.totalorder %s24_s20, 0  ;;  %p35_p2 = scmp.eq.s32.totalorder %s754_s15, 0 }
   0xa   : > { %p40_p3 = scmp.ne.s32.totalorder %s746_s13, %s742_s12  ;;  %p1020_p4 = scmp.eq.s32.totalorder %s807_s16, 0 }
   0xb   : > { %s823_s21 = scalar_select %p25_p1, %s750_s14, %s27_s19  }
   0xc   : > { %p825_p5 = por %p35_p2, %p34_p0  ;;  %p831_p6 = por %p1020_p4, %p40_p3 }
   0xd   : > { %p106_p7 = scmp.eq.s32.totalorder %s807_s16, 1  ;;  %p112_p8 = scmp.eq.s32.totalorder %s517_s17, 1 }
   0xe   : > { %s1025_s23 = scalar_select %p831_p6, 1, 0 }
   0xf   : > { %p518_p9 = scmp.ge.s32.totalorder %s754_s15, 1  ;;  %p119_p10 = scmp.lt.s32.totalorder %s754_s15, 3 }
  0x10   : > { %p838_p11 = por %p106_p7, %p34_p0  ;;  %p842_p12 = por %p112_p8, %p40_p3 }
  0x11   : > { %p846_p13 = pnand %p518_p9, %p119_p10  ;;  %s756_s27 = smov [#allocation5]  }
  0x12   : > { %s1026_s24 = scalar_select %p838_p11, 1, 0 }
  0x13   : > { %s1027_s25 = scalar_select %p842_p12, 1, 0 }
  0x14   : > { %s1028_s26 = scalar_select %p846_p13, 1, 0 }
  0x15   : > { %p545_p2 = pneg %p846_p13  ;;  %s132_s28 = sshll.u32 %s756_s27, 4  ;;  %s133_s28 = int_to_ptr.vmem [resolvable:$true] %s132_s28 }
  0x16   : > { %p562_p4 = scmp.lt.s32.totalorder %s754_s15, 2  ;;  %p1029_p0 = scmp.eq.s32.totalorder %s807_s16, 0 }
  0x17   : > { %s757_s4 = smov [#allocation7]   ;;  %s617_s6 = scalar_lea.vmem %s133_s28, 64 }
  0x18   : > { %p856_p7 = pnand %p545_p2, %p1029_p0  ;;  %p862_p3 = pnand %p562_p4, %p825_p5 }
  0x19   : > { %s143_s5 = sshll.u32 %s757_s4, 4  ;;  %p618_p9 = scmp.ne.s32.totalorder %s133_s28, %s617_s6  ;;  %s144_s5 = int_to_ptr.vmem [resolvable:$true] %s143_s5 }
  0x1a   : > { %p608_p8 = pneg %p856_p7  ;;  %p625_p0 = scmp.lt.s32.totalorder %s133_s28, %s133_s28 }
  0x1b   : > { %p626_p1 = scmp.lt.s32.totalorder %s617_s6, %s617_s6 }
  0x1c   : > { %p620_p10 = pnand %p618_p9, %p608_p8 }
  0x1d   : > { %p627_p12 = por %p626_p1, %p625_p0 }
  0x1e   : > { %p621_p2 = pneg %p620_p10 }
  0x20   : > { %p628_p11 = pnand %p627_p12, %p621_p2 }
  0x22   : > { %631 = shalt.err (!%p628_p11)
}
  0x23   : > { %548 = dma.hbm_to_vmem [thread:$0]  (!%p856_p7), %s1017_s1, 64, %s133_s28, [#allocation6]  }
  0x24   : > { %s154_s9 = sand.u32 1, %s750_s14   ;;  %s643_s10 = scalar_lea.vmem %s144_s5, 64 }
  0x25   : > { %p644_p4 = scmp.ne.s32.totalorder %s144_s5, %s643_s10  ;;  %p651_p10 = scmp.lt.s32.totalorder %s144_s5, %s144_s5 }
  0x26   : > { %p652_p6 = scmp.lt.s32.totalorder %s643_s10, %s643_s10 }
  0x27   : > { %p646_p5 = pnand %p644_p4, %p608_p8 }
  0x28   : > { %p653_p1 = por %p652_p6, %p651_p10 }
  0x29   : > { %p647_p9 = pneg %p646_p5 }
  0x2b   : > { %p654_p12 = pnand %p653_p1, %p647_p9 }
  0x2d   : > { %657 = shalt.err (!%p654_p12)
}
  0x2e   : > { %551 = dma.hbm_to_vmem [thread:$0]  (!%p856_p7), %s1018_s2, 64, %s144_s5, [#allocation6]  }
  0x2f   : > { %s522_s19 = sshll.u32 %s154_s9, 5  ;;  %s523_s20 = sshll.u32 %s754_s15, 7 }
  0x30   : > { %s889_s28 = scalar_lea.hbm %s1016_s0, %s523_s20  ;;  %s158_s4 = scalar_lea.vmem [#allocation2], %s522_s19 }
  0x31   : > { %s164_s6 = sshll.u32 %s158_s4, 4  ;;  %s893_s29 = scalar_lea.sflag [#allocation3], %s154_s9  ;;  %s891_s6 = int_to_ptr.vmem [resolvable:$true] %s164_s6 }
  0x32   : > { %s658_s7 = scalar_lea.hbm %s889_s28, 512  ;;  %p660_p11 = pneg %p862_p3 }
  0x33   : > { %p659_p6 = scmp.ne.s32.totalorder %s889_s28, %s658_s7  ;;  %s663_s10 = scalar_lea.hbm %s1016_s0, 1024 }
  0x34   : > { %p664_p2 = scmp.lt.s32.totalorder %s889_s28, %s1016_s0  ;;  %p665_p0 = scmp.lt.s32.totalorder %s663_s10, %s658_s7 }
  0x35   : > { %p661_p7 = pnand %p660_p11, %p659_p6 }
  0x36   : > { %p666_p4 = por %p665_p0, %p664_p2 }
  0x37   : > { %p662_p8 = pneg %p661_p7 }
  0x39   : > { %p667_p5 = pnand %p666_p4, %p662_p8 }
  0x3b   : > { %670 = shalt.err (!%p667_p5)
}
  0x3c   : > { %s671_s9 = scalar_lea.vmem %s891_s6, 512  ;;  %s758_s19 = smov [#allocation2]  }
  0x3d   : > { %p672_p9 = scmp.ne.s32.totalorder %s891_s6, %s671_s9  ;;  %s676_s20 = sshll.u32 %s758_s19, 4  ;;  %s677_s20 = int_to_ptr.vmem [resolvable:$false] %s676_s20 }
  0x3e   : > { %s678_s22 = scalar_lea.vmem %s677_s20, 1024  ;;  %p679_p12 = scmp.lt.s32.totalorder %s891_s6, %s677_s20 }
  0x3f   : > { %p674_p10 = pnand %p672_p9, %p660_p11  ;;  %p680_p6 = scmp.lt.s32.totalorder %s678_s22, %s671_s9 }
  0x41   : > { %p675_p1 = pneg %p674_p10  ;;  %p681_p7 = por %p680_p6, %p679_p12 }
  0x43   : > { %p682_p13 = pnand %p681_p7, %p675_p1 }
  0x45   : > { %685 = shalt.err (!%p682_p13)
}
  0x46   : > { %s759_s27 = smov 256   ;;  %s760_s4 = smov 128  }
  0x47   : > { %s761_s7 = smov 8   ;;  %p1032_p11 = scmp.ne.s32.totalorder %s1028_s26, 0 }
  0x48   : > { %555 = dma.hbm_to_vmem [thread:$0]  (!%p862_p3), %s889_s28, 512, %s891_s6, %s893_s29, %s759_s27, %s760_s4, %s761_s7  }
  0x49   : > { %176 = sbr.rel (%p1032_p11) target bundleno = 303 (0x12f), region = 32  ;;  %s917_s5 = sand.u32 (!%p1032_p11), 1, %s746_s13  }
  0x4a   : > { %s525_s8 = sshll.u32 (!%p1032_p11), %s917_s5, 5  ;;  %s179_s10 = scalar_lea.sflag (!%p1032_p11), [#allocation3], %s917_s5 }
  0x4b   : > { %s923_s11 = scalar_lea.vmem (!%p1032_p11), [#allocation2], %s525_s8  ;;  %p1033_p13 = scmp.ne.s32.totalorder (!%p1032_p11), %s1025_s23, 0 }
  0x4e   : > { %729 = dma.done.wait (%p1033_p13), %s179_s10, 512  }
  0x4f   : > { %731 = vsyncadd (%p1033_p13), %s179_s10, 4294966784  ;;  %p1034_p3 = scmp.eq.s32.totalorder %s807_s16, 0 }
  0x51   : > { %733 = dma.done.wait (%p1034_p3), [#allocation6], 128   ;;  %p1035_p8 = pmov %p1034_p3 }
  0x52   : > { %v219_v0 = vlaneseq  ;;  %v217_v3 = vld [vmem:[#allocation5] sm:$0x7]  ;;  %v218_v5 = vld [vmem:[#allocation7] sm:$0x7]  ;;  %v937_v16 = vld [vmem:[%s923_s11 + $0x8] sm:$0xff]  ;;  %s212_s23 = scalar_lea.vmem [#allocation8], %s525_s8 }
  0x53   : > { %735 = vsyncadd (%p1035_p8), [#allocation6], 4294967168  ;;  %v934_v15 = vld [vmem:[%s923_s11] sm:$0xff]  ;;  %v940_v17 = vld [vmem:[%s923_s11 + $0x10] sm:$0xff]  ;;  %s425_s26 = sshll.u32 %s212_s23, 4  ;;  %s530_s30 = sshll.u32 %s807_s16, 7  ;;  %s968_s26 = int_to_ptr.vmem [resolvable:$true] %s425_s26 }
  0x54   : > { %v220_v1 = vshrl.u32 %v219_v0, 7  ;;  %v943_v20 = vld [vmem:[%s923_s11 + $0x18] sm:$0xff]  ;;  %s973_s29 = scalar_lea.hbm %s1019_s3, %s530_s30  ;;  %s413_s16 = scalar_lea.sflag [#allocation4], %s917_s5 }
  0x55   : > { %s686_s17 = scalar_lea.vmem %s968_s26, 512  ;;  %p1036_p0 = scmp.ne.s32.totalorder %s1026_s24, 0 }
  0x56   : > { %v221_v2 = vsub.s32 0, %v220_v1  ;;  %v284_v7 = vsub.s32 1, %v220_v1  ;;  %v347_v10 = vsub.s32 2, %v220_v1  ;;  %p687_p2 = scmp.ne.s32.totalorder %s968_s26, %s686_s17  ;;  %s762_s9 = smov [#allocation8]  }
  0x57   : > { %s690_s19 = sshll.u32 %s762_s9, 4  ;;  %s691_s19 = int_to_ptr.vmem [resolvable:$false] %s690_s19 }
  0x58   : > { %v222_v4 = vrot.slane %v217_v3, %v221_v2  ;;  %v241_v6 = vrot.slane %v218_v5, %v221_v2  ;;  %v285_v8 = vrot.slane %v217_v3, %v284_v7  ;;  %v304_v9 = vrot.slane %v218_v5, %v284_v7  ;;  %p688_p4 = pnand %p687_p2, %p1036_p0  ;;  %s692_s20 = scalar_lea.vmem %s691_s19, 1024 }
  0x59   : > { %v348_v11 = vrot.slane %v217_v3, %v347_v10  ;;  %v367_v12 = vrot.slane %v218_v5, %v347_v10  ;;  %p693_p9 = scmp.lt.s32.totalorder %s968_s26, %s691_s19  ;;  %p694_p10 = scmp.lt.s32.totalorder %s692_s20, %s686_s17 }
  0x5a   : > { %224 = vbcast.lane.b32.xlu0 %v222_v4, 256  ;;  %232 = vbcast.lane.b32.xlu1 %v222_v4, 272  ;;  %p689_p5 = pneg %p688_p4 }
  0x5b   : > { %p695_p1 = por %p694_p10, %p693_p9 }
  0x5d   : > { %p696_p12 = pnand %p695_p1, %p689_p5 }
  0x5e   : > { %228 = vbcast.lane.b32.xlu0 %v222_v4, 264  ;;  %236 = vbcast.lane.b32.xlu1 %v222_v4, 280 }
  0x62   : > { %247 = vbcast.lane.b32.xlu1 %v241_v6, 264  ;;  %243 = vbcast.lane.b32.xlu0 %v241_v6, 256 }
  0x66   : > { %255 = vbcast.lane.b32.xlu1 %v241_v6, 280  ;;  %251 = vbcast.lane.b32.xlu0 %v241_v6, 272 }
  0x6a   : > { %291 = vbcast.lane.b32.xlu1 %v285_v8, 264  ;;  %287 = vbcast.lane.b32.xlu0 %v285_v8, 256 }
  0x6e   : > { %299 = vbcast.lane.b32.xlu1 %v285_v8, 280  ;;  %295 = vbcast.lane.b32.xlu0 %v285_v8, 272 }
  0x72   : > { %310 = vbcast.lane.b32.xlu1 %v304_v9, 264  ;;  %306 = vbcast.lane.b32.xlu0 %v304_v9, 256 }
  0x76   : > { %318 = vbcast.lane.b32.xlu1 %v304_v9, 280  ;;  %314 = vbcast.lane.b32.xlu0 %v304_v9, 272 }
  0x7a   : > { %354 = vbcast.lane.b32.xlu1 %v348_v11, 264  ;;  %350 = vbcast.lane.b32.xlu0 %v348_v11, 256 }
  0x7e   : > { %362 = vbcast.lane.b32.xlu1 %v348_v11, 280  ;;  %358 = vbcast.lane.b32.xlu0 %v348_v11, 272 }
  0x82   : > { %373 = vbcast.lane.b32.xlu1 %v367_v12, 264  ;;  %369 = vbcast.lane.b32.xlu0 %v367_v12, 256 }
  0x86   : > { %381 = vbcast.lane.b32.xlu1 %v367_v12, 280  ;;  %377 = vbcast.lane.b32.xlu0 %v367_v12, 272 }
  0xcc   : > { %v225_v13 = vpop.permute.xlu0 %224  ;;  %v233_v14 = vpop.permute.xlu1 %232 }
  0xcd   : > { %v257_v21 = vmul.f32 %v225_v13, %v934_v15  ;;  %v259_v23 = vmul.f32 %v233_v14, %v940_v17 }
  0xd0   : > { %v229_v18 = vpop.permute.xlu0 %228  ;;  %v237_v19 = vpop.permute.xlu1 %236 }
  0xd1   : > { %v258_v22 = vmul.f32 %v229_v18, %v937_v16  ;;  %v260_v25 = vmul.f32 %v237_v19, %v943_v20 }
  0xd3   : > { %v261_v24 = vadd.f32 %v258_v22, %v257_v21 }
  0xd4   : > { %v244_v28 = vpop.permute.xlu0 %243  ;;  %v248_v30 = vpop.permute.xlu1 %247 }
  0xd5   : > { %v262_v26 = vadd.f32 %v261_v24, %v259_v23 }
  0xd7   : > { %v263_v27 = vadd.f32 %v262_v26, %v260_v25 }
  0xd8   : > { %v252_v33 = vpop.permute.xlu0 %251  ;;  %v256_v35 = vpop.permute.xlu1 %255 }
  0xd9   : > { %v264_v29 = vrot.slane %v263_v27, 4 }
  0xdb   : > { %v265_v31 = vadd.f32 %v264_v29, %v263_v27 }
  0xdc   : > { %v288_v38 = vpop.permute.xlu0 %287  ;;  %v292_v43 = vpop.permute.xlu1 %291 }
  0xdd   : > { %v266_v32 = vrot.slane %v265_v31, 2 }
  0xdf   : > { %v267_v34 = vadd.f32 %v266_v32, %v265_v31 }
  0xe0   : > { %v296_v51 = vpop.permute.xlu0 %295  ;;  %v300_v55 = vpop.permute.xlu1 %299 }
  0xe1   : > { %v268_v36 = vrot.slane %v267_v34, 1 }
  0xe3   : > { %v269_v37 = vadd.f32 %v268_v36, %v267_v34 }
  0xe4   : > { %v307_v61 = vpop.permute.xlu0 %306  ;;  %v311_v63 = vpop.permute.xlu1 %310 }
  0xe5   : > { %v271_v39 = vmul.f32 %v269_v37, %v937_v16  ;;  %v270_v40 = vmul.f32 %v269_v37, %v934_v15  ;;  %v273_v41 = vmul.f32 %v269_v37, %v943_v20  ;;  %v272_v42 = vmul.f32 %v269_v37, %v940_v17 }
  0xe7   : > { %v275_v44 = vadd.f32 %v271_v39, %v248_v30  ;;  %v274_v45 = vadd.f32 %v270_v40, %v244_v28  ;;  %v277_v46 = vadd.f32 %v273_v41, %v256_v35  ;;  %v276_v47 = vadd.f32 %v272_v42, %v252_v33 }
  0xe8   : > { %v315_v2 = vpop.permute.xlu0 %314  ;;  %v319_v4 = vpop.permute.xlu1 %318 }
  0xe9   : > { %v279_v48 = vadd.f32 %v275_v44, %v937_v16  ;;  %v278_v49 = vadd.f32 %v274_v45, %v934_v15  ;;  %v280_v50 = vadd.f32 %v276_v47, %v940_v17  ;;  %v281_v54 = vadd.f32 %v277_v46, %v943_v20 }
  0xeb   : > { %v321_v52 = vmul.f32 %v292_v43, %v279_v48  ;;  %v320_v53 = vmul.f32 %v288_v38, %v278_v49  ;;  %v322_v57 = vmul.f32 %v296_v51, %v280_v50  ;;  %v323_v58 = vmul.f32 %v300_v55, %v281_v54 }
  0xec   : > { %v351_v7 = vpop.permute.xlu0 %350  ;;  %v355_v12 = vpop.permute.xlu1 %354 }
  0xed   : > { %v324_v56 = vadd.f32 %v321_v52, %v320_v53 }
  0xef   : > { %v325_v59 = vadd.f32 %v324_v56, %v322_v57 }
  0xf0   : > { %v359_v24 = vpop.permute.xlu0 %358  ;;  %v363_v28 = vpop.permute.xlu1 %362 }
  0xf1   : > { %v326_v60 = vadd.f32 %v325_v59, %v323_v58 }
  0xf3   : > { %v327_v62 = vrot.slane %v326_v60, 4 }
  0xf4   : > { %v374_v37 = vpop.permute.xlu1 %373  ;;  %v370_v38 = vpop.permute.xlu0 %369 }
  0xf5   : > { %v328_v0 = vadd.f32 %v327_v62, %v326_v60 }
  0xf7   : > { %v329_v1 = vrot.slane %v328_v0, 2 }
  0xf8   : > { %v382_v42 = vpop.permute.xlu1 %381  ;;  %v378_v43 = vpop.permute.xlu0 %377 }
  0xf9   : > { %v330_v3 = vadd.f32 %v329_v1, %v328_v0 }
  0xfb   : > { %v331_v5 = vrot.slane %v330_v3, 1 }
  0xfd   : > { %v332_v6 = vadd.f32 %v331_v5, %v330_v3 }
  0xff   : > { %v334_v8 = vmul.f32 %v332_v6, %v937_v16  ;;  %v333_v9 = vmul.f32 %v332_v6, %v934_v15  ;;  %v336_v10 = vmul.f32 %v332_v6, %v943_v20  ;;  %v335_v11 = vmul.f32 %v332_v6, %v940_v17 }
 0x101   : > { %v338_v13 = vadd.f32 %v334_v8, %v311_v63  ;;  %v337_v14 = vadd.f32 %v333_v9, %v307_v61  ;;  %v340_v18 = vadd.f32 %v336_v10, %v319_v4  ;;  %v339_v19 = vadd.f32 %v335_v11, %v315_v2 }
 0x103   : > { %v342_v21 = vadd.f32 %v338_v13, %v279_v48  ;;  %v341_v22 = vadd.f32 %v337_v14, %v278_v49  ;;  %v343_v23 = vadd.f32 %v339_v19, %v280_v50  ;;  %v344_v27 = vadd.f32 %v340_v18, %v281_v54 }
 0x105   : > { %v384_v25 = vmul.f32 %v355_v12, %v342_v21  ;;  %v383_v26 = vmul.f32 %v351_v7, %v341_v22  ;;  %v385_v30 = vmul.f32 %v359_v24, %v343_v23  ;;  %v386_v31 = vmul.f32 %v363_v28, %v344_v27 }
 0x107   : > { %v387_v29 = vadd.f32 %v384_v25, %v383_v26 }
 0x109   : > { %v388_v32 = vadd.f32 %v387_v29, %v385_v30 }
 0x10b   : > { %v389_v33 = vadd.f32 %v388_v32, %v386_v31 }
 0x10d   : > { %v390_v34 = vrot.slane %v389_v33, 4 }
 0x10f   : > { %v391_v35 = vadd.f32 %v390_v34, %v389_v33 }
 0x111   : > { %v392_v36 = vrot.slane %v391_v35, 2 }
 0x113   : > { %v393_v39 = vadd.f32 %v392_v36, %v391_v35 }
 0x115   : > { %v394_v40 = vrot.slane %v393_v39, 1 }
 0x117   : > { %v395_v41 = vadd.f32 %v394_v40, %v393_v39 }
 0x119   : > { %v397_v44 = vmul.f32 %v395_v41, %v937_v16  ;;  %v396_v45 = vmul.f32 %v395_v41, %v934_v15  ;;  %v399_v46 = vmul.f32 %v395_v41, %v943_v20  ;;  %v398_v47 = vmul.f32 %v395_v41, %v940_v17 }
 0x11b   : > { %v401_v48 = vadd.f32 %v397_v44, %v374_v37  ;;  %v400_v49 = vadd.f32 %v396_v45, %v370_v38  ;;  %v403_v50 = vadd.f32 %v399_v46, %v382_v42  ;;  %v402_v51 = vadd.f32 %v398_v47, %v378_v43 }
 0x11d   : > { %v405_v15 = vadd.f32 %v401_v48, %v342_v21  ;;  %v404_v16 = vadd.f32 %v400_v49, %v341_v22  ;;  %v407_v17 = vadd.f32 %v403_v50, %v344_v27  ;;  %v406_v20 = vadd.f32 %v402_v51, %v343_v23 }
 0x11f   : > { %409 = vst [vmem:[%s212_s23 + $0x8] sm:$0xff] %v405_v15  ;;  %408 = vst [vmem:[%s212_s23] sm:$0xff] %v404_v16 }
 0x120   : > { %411 = vst [vmem:[%s212_s23 + $0x18] sm:$0xff] %v407_v17  ;;  %410 = vst [vmem:[%s212_s23 + $0x10] sm:$0xff] %v406_v20 }
 0x121   : > { %699 = shalt.err (!%p696_p12)
}
 0x122   : > { %s700_s22 = scalar_lea.hbm %s973_s29, 512  ;;  %s704_s7 = scalar_lea.hbm %s1019_s3, 1024 }
 0x123   : > { %p701_p6 = scmp.ne.s32.totalorder %s973_s29, %s700_s22  ;;  %p705_p13 = scmp.lt.s32.totalorder %s973_s29, %s1019_s3 }
 0x124   : > { %p706_p3 = scmp.lt.s32.totalorder %s704_s7, %s700_s22 }
 0x125   : > { %p702_p7 = pnand %p701_p6, %p1036_p0 }
 0x126   : > { %p707_p8 = por %p706_p3, %p705_p13 }
 0x127   : > { %p703_p11 = pneg %p702_p7 }
 0x129   : > { %p708_p2 = pnand %p707_p8, %p703_p11 }
 0x12b   : > { %711 = shalt.err (!%p708_p2)
}
 0x12c   : > { %s763_s11 = smov 128   ;;  %s764_s23 = smov 256  }
 0x12d   : > { %s765_s30 = smov 8  }
 0x12e   : > { %543 = dma.vmem_to_hbm [thread:$0]  (%p1036_p0), %s968_s26, 512, %s973_s29, %s413_s16, %s763_s11, %s764_s23, %s765_s30  }
 0x12f PF: > { %s440_s28 = sand.u32 1, %s742_s12   ;;  %p1037_p4 = scmp.ne.s32.totalorder %s1027_s25, 0 }
 0x130   : > { %p1038_p5 = scmp.ge.s32.totalorder %s754_s15, 2  ;;  %s441_s6 = scalar_lea.sflag [#allocation4], %s440_s28 }
 0x132   : > { %p557_p9 = pnand %p1038_p5, %p1037_p4 }
 0x134   : > { %p558_p10 = pneg %p557_p9 }
 0x136   : > { %737 = dma.done.wait (%p558_p10), %s441_s6, 512  }
 0x137   : > { %739 = vsyncadd (%p558_p10), %s441_s6, 4294966784  ;;  %p17_p1 = scmp.ge.s32.totalorder %s811_s18, 4   ;;  %s1039_s12 = smov %s746_s13 }
 0x138   : > { %s1040_s13 = smov %s750_s14  ;;  %s1041_s14 = smov %s823_s21 }
 0x139   : > { %s1042_s15 = smov %s811_s18  ;;  %19 = sbr.rel (!%p17_p1) target bundleno = 6 (0x6), region = 85 }
 0x13e   :  { %446 = vsyncpa [#allocation3], 1 }
 0x13f   :  { %448 = vsyncpa [#allocation3 + $0x1], 1 }
 0x140   :  { %449 = vsyncpa [#allocation6], 1 }
 0x141   :  { %450 = vsyncpa [#allocation4], 1 }
 0x142   :  { %452 = vsyncpa [#allocation4 + $0x1], 1 }

</bundles_post_ra>
